<compile_context>
chip_gen: v5e
topology: v5e:2x2
jax: 0.10.0
libtpu: 0.0.40
codegen_flags: <defaults>
</compile_context>

<pallas_src>
import jax
import jax.numpy as jnp
import numpy as np
from jax.experimental import pallas as pl
from jax.experimental.pallas import tpu as pltpu


# ----------------------------------------------------------------------------
# Fused kernel: in-kernel concat + twin-Q 3-layer MLP as 3 matmuls.
# ----------------------------------------------------------------------------
def qnet_kernel(x_ref, g_ref, a_ref, w1_ref, b1_ref, w2_ref, b2_ref,
                w3_ref, b3_ref, out_ref, xu_ref):
    obs = x_ref.shape[1]
    gl = g_ref.shape[1]
    act = a_ref.shape[1]

    # Fused torch.cat([x, goal, action], dim=1): three static lane-slice
    # stores into one (B, D_in) VMEM scratch (all inside a single vreg tile).
    xu_ref[:, 0:obs] = x_ref[...]
    xu_ref[:, obs:obs + gl] = g_ref[...]
    xu_ref[:, obs + gl:obs + gl + act] = a_ref[...]
    xu = xu_ref[...]                                               # (B, D_in)

    # Twin-Q (Q1 | Q2) packed weights: whole forward is 3 MXU matmuls.
    h1 = jnp.dot(xu, w1_ref[...], preferred_element_type=jnp.float32) + b1_ref[...]
    h1 = jnp.maximum(h1, 0.0)                                      # (B, 2*H1)
    h2 = jnp.dot(h1, w2_ref[...], preferred_element_type=jnp.float32) + b2_ref[...]
    h2 = jnp.maximum(h2, 0.0)                                      # (B, 2*H2)
    q = jnp.dot(h2, w3_ref[...], preferred_element_type=jnp.float32) + b3_ref[...]
    out_ref[...] = q.astype(out_ref.dtype)                         # one (B, 2) store


# ----------------------------------------------------------------------------
# Wrapper: single pallas_call, whole-array VMEM blocks, no grid.
# ----------------------------------------------------------------------------
def qnetwork_forward(action_, x, goal, packed):
    """Twin-Q forward. `packed` holds the Q1/Q2 weights repacked side-by-side."""
    B = x.shape[0]
    d_in = x.shape[1] + goal.shape[1] + action_.shape[1]
    w1, b1, w2, b2, w3, b3 = (packed[k] for k in ("w1", "b1", "w2", "b2", "w3", "b3"))

    h1p, h2p = w1.shape[1], w2.shape[1]
    flops = 2 * B * (d_in * h1p + h1p * h2p + h2p * 2)
    bytes_accessed = 4 * (B * d_in + w1.size + b1.size + w2.size + b2.size
                          + w3.size + b3.size + B * 2)

    vmem = pl.BlockSpec(memory_space=pltpu.MemorySpace.VMEM)
    q = pl.pallas_call(
        qnet_kernel,
        out_shape=jax.ShapeDtypeStruct((B, 2), jnp.float32),
        in_specs=[vmem] * 9,                     # x, goal, action, w1,b1,w2,b2,w3,b3
        out_specs=vmem,
        scratch_shapes=[pltpu.VMEM((B, d_in), jnp.float32)],   # concat buffer
        cost_estimate=pl.CostEstimate(flops=flops, transcendentals=0,
                                      bytes_accessed=bytes_accessed),
    )(x, goal, action_, w1, b1, w2, b2, w3, b3)

    # Packed (B, 2) Q values; slice lazily only to present the module's (x1, x2) API.
    return q[:, 0:1], q[:, 1:2]


# ----------------------------------------------------------------------------
# Parameter init (PyTorch nn.Linear default: U(-1/sqrt(fan_in), +1/sqrt(fan_in)))
# and one-time repack of the two Q nets into a single matmul chain.
# ----------------------------------------------------------------------------
def init_params(key, obs, goal, act, h1, h2):
    d_in = obs + goal + act

    def linear(key, fan_in, fan_out):
        kw, kb = jax.random.split(key)
        bound = 1.0 / np.sqrt(fan_in)
        w = jax.random.uniform(kw, (2, fan_in, fan_out), jnp.float32, -bound, bound)
        b = jax.random.uniform(kb, (2, fan_out), jnp.float32, -bound, bound)
        return w, b

    k1, k2, k3 = jax.random.split(key, 3)
    w1, b1 = linear(k1, d_in, h1)
    w2, b2 = linear(k2, h1, h2)
    w3, b3 = linear(k3, h2, 1)
    return dict(w1=w1, b1=b1, w2=w2, b2=b2, w3=w3, b3=b3)


def pack_params(p):
    """One-time repack: Q1/Q2 side-by-side so the twin forward is 3 matmuls."""
    h1 = p["w1"].shape[2]
    h2 = p["w2"].shape[2]
    w1 = jnp.concatenate([p["w1"][0], p["w1"][1]], axis=1)            # (D_in, 2*H1)
    b1 = jnp.concatenate([p["b1"][0], p["b1"][1]])[None, :]           # (1, 2*H1)
    w2 = jnp.zeros((2 * h1, 2 * h2), jnp.float32)                     # block-diagonal
    w2 = w2.at[:h1, :h2].set(p["w2"][0]).at[h1:, h2:].set(p["w2"][1])
    b2 = jnp.concatenate([p["b2"][0], p["b2"][1]])[None, :]           # (1, 2*H2)
    w3 = jnp.zeros((2 * h2, 2), jnp.float32)                          # two columns
    w3 = w3.at[:h2, 0].set(p["w3"][0, :, 0]).at[h2:, 1].set(p["w3"][1, :, 0])
    b3 = jnp.array([[p["b3"][0, 0], p["b3"][1, 0]]], jnp.float32)     # (1, 2)
    return dict(w1=w1, b1=b1, w2=w2, b2=b2, w3=w3, b3=b3)


def reference_forward(action_, x, goal, p):
    xu = jnp.concatenate([x, goal, action_], axis=1)
    outs = []
    for q in range(2):
        h = jnp.maximum(xu @ p["w1"][q] + p["b1"][q], 0.0)
        h = jnp.maximum(h @ p["w2"][q] + p["b2"][q], 0.0)
        outs.append(h @ p["w3"][q] + p["b3"][q])
    return outs[0], outs[1]


if __name__ == "__main__":
    # Small shapes consistent with the module: obs=16, goal=8, action=8 -> D_in=32.
    B, OBS, GOAL, ACT = 2, 16, 8, 8
    H1, H2 = 32, 32

    key = jax.random.PRNGKey(0)
    kx, kg, ka, kp = jax.random.split(key, 4)
    x = jax.random.normal(kx, (B, OBS), jnp.float32)
    goal = jax.random.normal(kg, (B, GOAL), jnp.float32)
    action_ = jax.random.normal(ka, (B, ACT), jnp.float32)

    params = init_params(kp, OBS, GOAL, ACT, H1, H2)
    packed = pack_params(params)          # one-time repack, outside the hot path

    x1, x2 = qnetwork_forward(action_, x, goal, packed)
    x1 = jax.block_until_ready(x1)
    x2 = jax.block_until_ready(x2)

    r1, r2 = reference_forward(action_, x, goal, params)
    assert x1.shape == (B, 1) and x2.shape == (B, 1)
    np.testing.assert_allclose(np.asarray(x1), np.asarray(r1), rtol=1e-4, atol=1e-4)
    np.testing.assert_allclose(np.asarray(x2), np.asarray(r2), rtol=1e-4, atol=1e-4)

    print("KERNEL_OK")
</pallas_src>

<mosaic_0001>
module attributes {stable_mosaic.version = 11 : i64} {
  func.func @qnet_kernel(%arg0: memref<2x16xf32, #tpu.memory_space<vmem>>, %arg1: memref<2x8xf32, #tpu.memory_space<vmem>>, %arg2: memref<2x8xf32, #tpu.memory_space<vmem>>, %arg3: memref<32x64xf32, #tpu.memory_space<vmem>>, %arg4: memref<1x64xf32, #tpu.memory_space<vmem>>, %arg5: memref<64x64xf32, #tpu.memory_space<vmem>>, %arg6: memref<1x64xf32, #tpu.memory_space<vmem>>, %arg7: memref<64x2xf32, #tpu.memory_space<vmem>>, %arg8: memref<1x2xf32, #tpu.memory_space<vmem>>, %arg9: memref<2x2xf32, #tpu.memory_space<vmem>>, %arg10: memref<2x32xf32, #tpu.memory_space<vmem>>) attributes {dimension_semantics = [], scalar_prefetch = 0 : i64, scratch_operands = 1 : i64, tpu.core_type = #tpu.core_type<tc>} {
    %c0 = arith.constant 0 : index
    %c0_0 = arith.constant 0 : index
    %0 = vector.load %arg0[%c0, %c0_0] : memref<2x16xf32, #tpu.memory_space<vmem>>, vector<2x16xf32>
    %c0_1 = arith.constant 0 : index
    %c0_2 = arith.constant 0 : index
    %1 = vector.load %arg10[%c0_1, %c0_2] : memref<2x32xf32, #tpu.memory_space<vmem>>, vector<2x16xf32>
    tpu.vector_store %arg10[%c0_1, %c0_2], %0 {strides = array<i32>} : memref<2x32xf32, #tpu.memory_space<vmem>>, vector<2x16xf32>,
    %c0_3 = arith.constant 0 : index
    %c0_4 = arith.constant 0 : index
    %2 = vector.load %arg1[%c0_3, %c0_4] : memref<2x8xf32, #tpu.memory_space<vmem>>, vector<2x8xf32>
    %c0_5 = arith.constant 0 : index
    %c16 = arith.constant 16 : index
    %3 = vector.load %arg10[%c0_5, %c16] : memref<2x32xf32, #tpu.memory_space<vmem>>, vector<2x8xf32>
    tpu.vector_store %arg10[%c0_5, %c16], %2 {strides = array<i32>} : memref<2x32xf32, #tpu.memory_space<vmem>>, vector<2x8xf32>,
    %c0_6 = arith.constant 0 : index
    %c0_7 = arith.constant 0 : index
    %4 = vector.load %arg2[%c0_6, %c0_7] : memref<2x8xf32, #tpu.memory_space<vmem>>, vector<2x8xf32>
    %c0_8 = arith.constant 0 : index
    %c24 = arith.constant 24 : index
    %5 = vector.load %arg10[%c0_8, %c24] : memref<2x32xf32, #tpu.memory_space<vmem>>, vector<2x8xf32>
    tpu.vector_store %arg10[%c0_8, %c24], %4 {strides = array<i32>} : memref<2x32xf32, #tpu.memory_space<vmem>>, vector<2x8xf32>,
    %c0_9 = arith.constant 0 : index
    %c0_10 = arith.constant 0 : index
    %6 = vector.load %arg10[%c0_9, %c0_10] : memref<2x32xf32, #tpu.memory_space<vmem>>, vector<2x32xf32>
    %c0_11 = arith.constant 0 : index
    %c0_12 = arith.constant 0 : index
    %7 = vector.load %arg3[%c0_11, %c0_12] : memref<32x64xf32, #tpu.memory_space<vmem>>, vector<32x64xf32>
    %cst = arith.constant dense<0.000000e+00> : vector<2x64xf32>
    %8 = tpu.matmul %6, %7, %cst {dimension_numbers = #tpu.dot_dimension_numbers<[1], [0], [0], [1], [0, 0, 1, 1], [], []>} : vector<2x32xf32>, vector<32x64xf32>, vector<2x64xf32> -> vector<2x64xf32>
    %c0_13 = arith.constant 0 : index
    %c0_14 = arith.constant 0 : index
    %9 = vector.load %arg4[%c0_13, %c0_14] : memref<1x64xf32, #tpu.memory_space<vmem>>, vector<1x64xf32>
    %10 = vector.broadcast %9 : vector<1x64xf32> to vector<2x64xf32>
    %11 = arith.addf %8, %10 : vector<2x64xf32>
    %cst_15 = arith.constant 0.000000e+00 : f32
    %12 = vector.broadcast %cst_15 : f32 to vector<2x64xf32>
    %13 = arith.maximumf %11, %12 : vector<2x64xf32>
    %c0_16 = arith.constant 0 : index
    %c0_17 = arith.constant 0 : index
    %14 = vector.load %arg5[%c0_16, %c0_17] : memref<64x64xf32, #tpu.memory_space<vmem>>, vector<64x64xf32>
    %cst_18 = arith.constant dense<0.000000e+00> : vector<2x64xf32>
    %15 = tpu.matmul %13, %14, %cst_18 {dimension_numbers = #tpu.dot_dimension_numbers<[1], [0], [0], [1], [0, 0, 1, 1], [], []>} : vector<2x64xf32>, vector<64x64xf32>, vector<2x64xf32> -> vector<2x64xf32>
    %c0_19 = arith.constant 0 : index
    %c0_20 = arith.constant 0 : index
    %16 = vector.load %arg6[%c0_19, %c0_20] : memref<1x64xf32, #tpu.memory_space<vmem>>, vector<1x64xf32>
    %17 = vector.broadcast %16 : vector<1x64xf32> to vector<2x64xf32>
    %18 = arith.addf %15, %17 : vector<2x64xf32>
    %cst_21 = arith.constant 0.000000e+00 : f32
    %19 = vector.broadcast %cst_21 : f32 to vector<2x64xf32>
    %20 = arith.maximumf %18, %19 : vector<2x64xf32>
    %c0_22 = arith.constant 0 : index
    %c0_23 = arith.constant 0 : index
    %21 = vector.load %arg7[%c0_22, %c0_23] : memref<64x2xf32, #tpu.memory_space<vmem>>, vector<64x2xf32>
    %cst_24 = arith.constant dense<0.000000e+00> : vector<2x2xf32>
    %22 = tpu.matmul %20, %21, %cst_24 {dimension_numbers = #tpu.dot_dimension_numbers<[1], [0], [0], [1], [0, 0, 1, 1], [], []>} : vector<2x64xf32>, vector<64x2xf32>, vector<2x2xf32> -> vector<2x2xf32>
    %c0_25 = arith.constant 0 : index
    %c0_26 = arith.constant 0 : index
    %23 = vector.load %arg8[%c0_25, %c0_26] : memref<1x2xf32, #tpu.memory_space<vmem>>, vector<1x2xf32>
    %24 = vector.broadcast %23 : vector<1x2xf32> to vector<2x2xf32>
    %25 = arith.addf %22, %24 : vector<2x2xf32>
    %c0_27 = arith.constant 0 : index
    %c0_28 = arith.constant 0 : index
    %26 = vector.load %arg9[%c0_27, %c0_28] : memref<2x2xf32, #tpu.memory_space<vmem>>, vector<2x2xf32>
    tpu.vector_store %arg9[%c0_27, %c0_28], %25 {strides = array<i32>} : memref<2x2xf32, #tpu.memory_space<vmem>>, vector<2x2xf32>,
    return
  }
}

</mosaic_0001>

<bundles_post_ra>
// kernel: tpu_custom_call.1
= control target key start
LH: loop header
LB: loop body
LE: loop exit
PB: predicated region body
PF: predicated region fallthrough
CT: control target
= control target key end

     0   :  { %14 = vsyncpa [#allocation4], 0  ;;  %s465_s0 = inlined_call_operand.vmem [shape: f32[2,16], index: 0, kind: input, shape index: {}]   ;;  %s466_s1 = inlined_call_operand.vmem [shape: f32[2,8], index: 1, kind: input, shape index: {}]   ;;  %s467_s2 = inlined_call_operand.hbm [shape: f32[2,8], index: 2, kind: input, shape index: {}]   ;;  %s468_s3 = inlined_call_operand.hbm [shape: f32[32,64], index: 3, kind: input, shape index: {}]   ;;  %s469_s4 = inlined_call_operand.vmem [shape: f32[1,64], index: 4, kind: input, shape index: {}]   ;;  %s470_s5 = inlined_call_operand.vmem [shape: f32[64,64], index: 5, kind: input, shape index: {}]   ;;  %s471_s6 = inlined_call_operand.hbm [shape: f32[1,64], index: 6, kind: input, shape index: {}]   ;;  %s472_s7 = inlined_call_operand.vmem [shape: f32[64,2], index: 7, kind: input, shape index: {}]   ;;  %s473_s8 = inlined_call_operand.vmem [shape: f32[1,2], index: 8, kind: input, shape index: {}]   ;;  %s474_s9 = inlined_call_operand.hbm [shape: f32[2,2], index: 9, kind: output, shape index: {}]  }
   0x1   :  { %15 = vsyncpa [#allocation7], 0  ;;  %s36_s11 = sshll.u32 %s468_s3, 4  ;;  %s37_s11 = int_to_ptr.hbm [resolvable:$true] %s36_s11 }
   0x2   :  { %16 = vsyncpa [#allocation5], 0  ;;  %s335_s12 = smov [#allocation6]   ;;  %s26_s16 = sshll.u32 %s467_s2, 4  ;;  %s27_s16 = int_to_ptr.hbm [resolvable:$true] %s26_s16 }
   0x3   :  { %s38_s13 = sshll.u32 %s335_s12, 4  ;;  %s336_s17 = smov 128   ;;  %s39_s13 = int_to_ptr.vmem [resolvable:$true] %s38_s13 }
   0x4   :  { %s337_s18 = smov 8   ;;  %s338_s19 = smov [#allocation3]  }
   0x5   :  { %44 = dma.hbm_to_vmem [thread:$0]  %s37_s11, 512, %s39_s13, [#allocation7], %s336_s17, %s336_s17, %s337_s18  }
   0x6   :  { %s28_s20 = sshll.u32 %s338_s19, 4  ;;  %s54_s23 = sshll.u32 %s471_s6, 4  ;;  %s29_s20 = int_to_ptr.vmem [resolvable:$true] %s28_s20  ;;  %s55_s23 = int_to_ptr.hbm [resolvable:$true] %s54_s23 }
   0x7   :  { %31 = dma.hbm_to_vmem [thread:$0]  %s27_s16, 32, %s29_s20, [#allocation4]  }
   0x8   :  { %s339_s3 = smov [#allocation8]  }
   0x9   :  { %s56_s24 = sshll.u32 %s339_s3, 4  ;;  %s57_s24 = int_to_ptr.vmem [resolvable:$true] %s56_s24 }
   0xa   :  { %59 = dma.hbm_to_vmem [thread:$0]  %s55_s23, 16, %s57_s24, [#allocation7]  }
   0xb   :  { %329 = dma.done.wait [#allocation4], 32  }
   0xc   :  { %330 = vsyncadd [#allocation4], 4294967264 }
   0xd   :  { %331 = dma.done.wait [#allocation7], 528  }
   0xe   :  { %332 = vsyncadd [#allocation7], 4294966768  ;;  %v79_v0 = vld [vmem:[%s466_s1] sm:$0x3]  ;;  %s340_s26 = smov 16   ;;  %s341_s27 = smov 24  }
   0xf   :  { %81 = vrot.lane.b32.xlu0 %v79_v0, %s340_s26  ;;  %v86_v1 = vld [vmem:[#allocation3] sm:$0x3]  ;;  %vm77_vm0 = vcmask 123904   ;;  %v76_v2 = vld [vmem:[%s465_s0] sm:$0x3]  ;;  %v96_v4 = vld [vmem:[#allocation6 + $0x10] sm:$0xff] }
  0x10   :  { %78 = vst.msk [vmem:[#allocation2] sm:$0x3] %vm77_vm0, %v76_v2  ;;  %v97_v3 = vld [vmem:[#allocation6 + $0x18] sm:$0xff]  ;;  %v95_v5 = vld [vmem:[#allocation6 + $0x8] sm:$0xff]  ;;  %v94_v6 = vld [vmem:[#allocation6] sm:$0xff]  ;;  %vm84_vm1 = vcmask 189568  }
  0x11   :  { %118 = vmatpush.msra.mxu0 %v97_v3  ;;  %v134_v7 = vld [vmem:[%s470_s5 + $0x38] sm:$0xff]  ;;  %v133_v8 = vld [vmem:[%s470_s5 + $0x30] sm:$0xff]  ;;  %v132_v9 = vld [vmem:[%s470_s5 + $0x28] sm:$0xff]  ;;  %vm91_vm2 = vcmask 255168   ;;  %vm102_vm3 = vcmask 261120   ;;  %vm139_vm4 = vcmask 523264  }
  0x12   :  { %151 = vmatpush.msra.mxu1 %v134_v7  ;;  %v131_v10 = vld [vmem:[%s470_s5 + $0x20] sm:$0xff]  ;;  %v130_v11 = vld [vmem:[%s470_s5 + $0x18] sm:$0xff]  ;;  %v129_v15 = vld [vmem:[%s470_s5 + $0x10] sm:$0xff]  ;;  %s342_s14 = smov [#allocation9]   ;;  %s208_s18 = sshll.u32 %s474_s9, 4  ;;  %vm199_vm5 = vcmask 9216   ;;  %s209_s18 = int_to_ptr.hbm [resolvable:$true] %s208_s18 }
  0x13   :  { %119 = vmatpush.msra.mxu0 %v96_v4  ;;  %v128_v16 = vld [vmem:[%s470_s5 + $0x8] sm:$0xff]  ;;  %v127_v17 = vld [vmem:[%s470_s5] sm:$0xff]  ;;  %v171_v18 = vld [vmem:[%s472_s7 + $0x38] sm:$0xff]  ;;  %s206_s15 = sshll.u32 %s342_s14, 4  ;;  %s207_s15 = int_to_ptr.vmem [resolvable:$true] %s206_s15 }
  0x14   :  { %152 = vmatpush.msra.mxu1 %v133_v8  ;;  %v170_v19 = vld [vmem:[%s472_s7 + $0x30] sm:$0xff]  ;;  %187 = vmatpush.msra.mxu2 %v171_v18  ;;  %v169_v20 = vld [vmem:[%s472_s7 + $0x28] sm:$0xff]  ;;  %v168_v21 = vld [vmem:[%s472_s7 + $0x20] sm:$0xff] }
  0x15   :  { %120 = vmatpush.msra.mxu0 %v95_v5  ;;  %v167_v22 = vld [vmem:[%s472_s7 + $0x18] sm:$0xff]  ;;  %v230_v23 = vld [vmem:[%s469_s4] ss:$0 sm:$0xff]  ;;  %v166_v27 = vld [vmem:[%s472_s7 + $0x10] sm:$0xff] }
  0x16   :  { %153 = vmatpush.msra.mxu1 %v132_v9  ;;  %188 = vmatpush.msra.mxu2 %v170_v19  ;;  %v165_v28 = vld [vmem:[%s472_s7 + $0x8] sm:$0xff]  ;;  %v164_v29 = vld [vmem:[%s472_s7] sm:$0xff] }
  0x17   :  { %88 = vrot.lane.b32.xlu0 %v86_v1, %s341_s27  ;;  %121 = vmatpush.msra.mxu0 %v94_v6  ;;  %v231_v30 = vld [vmem:[#allocation8] ss:$0 sm:$0xff]  ;;  %v232_v34 = vld [vmem:[%s473_s8] ss:$0 sm:$0xff] }
  0x18   :  { %154 = vmatpush.msra.mxu1 %v131_v10  ;;  %189 = vmatpush.msra.mxu2 %v169_v20 }
  0x1a   :  { %155 = vmatpush.msra.mxu1 %v130_v11  ;;  %190 = vmatpush.msra.mxu2 %v168_v21 }
  0x1c   :  { %156 = vmatpush.msra.mxu1 %v129_v15  ;;  %191 = vmatpush.msra.mxu2 %v167_v22 }
  0x1e   :  { %157 = vmatpush.msra.mxu1 %v128_v16  ;;  %192 = vmatpush.msra.mxu2 %v166_v27 }
  0x20   :  { %158 = vmatpush.msra.mxu1 %v127_v17  ;;  %193 = vmatpush.msra.mxu2 %v165_v28 }
  0x22   :  { %194 = vmatpush.msra.mxu2 %v164_v29 }
  0x81   :  { %v82_v12 = vpop.permute.xlu0 %81 }
  0x82   :  { %85 = vst.msk [vmem:[#allocation2] sm:$0x3] %vm84_vm1, %v82_v12 }
  0x89   :  { %v89_v13 = vpop.permute.xlu0 %88 }
  0x8a   :  { %92 = vst.msk [vmem:[#allocation2] sm:$0x3] %vm91_vm2, %v89_v13 }
  0x91   :  { %v93_v14 = vld [vmem:[#allocation2] sm:$0x3] }
  0x92   :  { %219 = vmatmul.msk.f32.vlgmr.msra.gmra.mxu0 %vm102_vm3, %v93_v14 }
 0x10f   :  { %v123_v24 = vpop.f32.mrf.mxu0 }
 0x110   :  { %v124_v25 = vadd.f32 %v230_v23, %v123_v24 }
 0x112   :  { %v126_v26 = vmax.f32 %v124_v25, 0.0 }
 0x114   :  { %220 = vmatmul.msk.f32.vlgmr.msra.gmra.mxu1 %vm139_vm4, %v126_v26 }
 0x191   :  { %v160_v31 = vpop.f32.mrf.mxu1 }
 0x192   :  { %v161_v32 = vadd.f32 %v231_v30, %v160_v31 }
 0x194   :  { %v163_v33 = vmax.f32 %v161_v32, 0.0 }
 0x196   :  { %221 = vmatmul.msk.f32.vlgmr.msra.gmra.mxu2 %vm139_vm4, %v163_v33 }
 0x219   :  { %v196_v35 = vpop.f32.mrf.mxu2 }
 0x21a   :  { %v197_v36 = vadd.f32 %v232_v34, %v196_v35 }
 0x21c   :  { %200 = vst.msk [vmem:[#allocation9] sm:$0x3] %vm199_vm5, %v197_v36 }
 0x21d   :  { %211 = dma.vmem_to_hbm [thread:$0]  %s207_s15, 32, %s209_s18, [#allocation5]  }
 0x21e   :  { %333 = dma.done.wait [#allocation5], 32  }
 0x21f   :  { %334 = vsyncadd [#allocation5], 4294967264 }
 0x220   :  { %216 = vsyncpa [#allocation4], 1 }
 0x221   :  { %217 = vsyncpa [#allocation7], 1 }
 0x222   :  { %218 = vsyncpa [#allocation5], 1 }

</bundles_post_ra>
